<compile_context>
chip_gen: v6e
topology: v6e:2x2x1
jax: 0.10.0
libtpu: 0.0.40
codegen_flags: <defaults>
</compile_context>

<pallas_src>
import functools

import jax
import jax.numpy as jnp
from jax import lax
from jax.experimental import pallas as pl
from jax.experimental.pallas import tpu as pltpu

_LANE = 128
_SUBLANE = 8


def _round_up(n: int, m: int) -> int:
    return ((n + m - 1) // m) * m


def _cdiv(a: int, b: int) -> int:
    return (a + b - 1) // b


def _act(name, h):
    if name == "relu":
        return jnp.maximum(h, 0.0)
    if name == "gelu":
        return jax.nn.gelu(h)
    if name == "sigmoid":
        return jax.nn.sigmoid(h)
    if name == "tanh":
        return jnp.tanh(h)
    if name == "softplus":
        return jax.nn.softplus(h)
    if name == "linear":
        return h
    raise ValueError(name)


def _vmem_ceiling_bytes() -> int:
    """Generation-aware scoped-VMEM ceiling: half of physical VMEM.

    ~64 MiB on v5e/v6e (128 MiB physical), ~32 MiB on v7x (64 MiB physical).
    Falls back to 32 MiB if the hardware query is unavailable.
    """
    try:
        cap = int(pltpu.get_tpu_info().vmem_capacity_bytes)
    except Exception:
        cap = 64 << 20
    return max(cap // 2, 16 << 20)


def _make_mlp_kernel(n_hidden_layers: int, hidden_act: str, output_act: str,
                     compute_dtype):
    """Fused-MLP kernel body, all layers unrolled, batch-on-lanes orientation."""

    def kernel(*refs):
        # refs = (x, w0, b0, w1, b1, ..., w_out, b_out, out)
        x_ref = refs[0]
        param_refs = refs[1:-1]
        out_ref = refs[-1]

        x = x_ref[...]                                  # (TB, D), compute_dtype
        w0 = param_refs[0][...]                         # (H, D),  compute_dtype
        # h = W0 @ x^T on the MXU (rhs-transposed contraction), f32 accumulation.
        h = lax.dot_general(w0, x, (((1,), (1,)), ((), ())),
                            preferred_element_type=jnp.float32)   # (H, TB) f32
        h = _act(hidden_act, h + param_refs[1][...])    # bias (H, 1) broadcasts on lanes

        for i in range(1, n_hidden_layers):
            w = param_refs[2 * i][...]                  # (H, H), compute_dtype
            b = param_refs[2 * i + 1][...]              # (H, 1), f32
            h_in = h.astype(compute_dtype)              # no-op when compute_dtype is f32
            h = lax.dot_general(w, h_in, (((1,), (0,)), ((), ())),
                                preferred_element_type=jnp.float32)  # (H, TB) f32
            h = _act(hidden_act, h + b)

        # Output layer Linear(H, 1): VPU multiply + XLU sublane reduce.
        w_out = param_refs[-2][...]                     # (H, 1), f32
        b_out = param_refs[-1][...]                     # (1, 1), f32
        y = jnp.sum(w_out * h, axis=0, keepdims=True) + b_out      # (1, TB) f32
        y = _act(output_act, y)
        out_ref[...] = y.astype(out_ref.dtype)          # lane-dense (1, TB) store

    return kernel


def init_mlp_params(key, dim, n_hidden_nodes, n_hidden_layers):
    """Matches the PyTorch module init: W ~ N(0, 0.01), b = 0.

    Layout (chosen for the kernel):
      hidden weights  : (out_features, in_features)   [PyTorch layout]
      hidden biases   : (out_features, 1)
      output weight   : (n_hidden_nodes, 1)            [= PyTorch (1, H) transposed]
      output bias     : (1, 1)
    """
    params = []
    in_f = dim
    for _ in range(n_hidden_layers):
        key, sub = jax.random.split(key)
        w = 0.01 * jax.random.normal(sub, (n_hidden_nodes, in_f), jnp.float32)
        b = jnp.zeros((n_hidden_nodes, 1), jnp.float32)
        params.extend([w, b])
        in_f = n_hidden_nodes
    key, sub = jax.random.split(key)
    w_out = 0.01 * jax.random.normal(sub, (in_f, 1), jnp.float32)
    b_out = jnp.zeros((1, 1), jnp.float32)
    params.extend([w_out, b_out])
    return params


@functools.partial(
    jax.jit,
    static_argnames=("n_hidden_layers", "hidden_act", "output_act", "block_rows"))
def mlp_estimator_forward(x, params, *, n_hidden_layers, hidden_act, output_act,
                          block_rows=None):
    # glue: torch's x.view(B, -1)
    batch = x.shape[0]
    x2d = x.reshape(batch, -1)
    dim = x2d.shape[1]
    n_nodes = params[0].shape[0]

    # Guard the compute dtype (v7x MXU has no integer path; fp8 not validated).
    # bf16 x is the documented fast path: it halves the dominant x HBM read.
    if x2d.dtype == jnp.bfloat16:
        compute_dtype = jnp.bfloat16
    elif x2d.dtype == jnp.float32:
        compute_dtype = jnp.float32
    else:
        x2d = x2d.astype(jnp.float32)
        compute_dtype = jnp.float32
    itemsize = x2d.dtype.itemsize

    # Hidden-layer weights feed the MXU in the compute dtype; biases and the
    # output head stay f32 (f32 accumulation / VPU math everywhere).
    cast_params = []
    for i in range(n_hidden_layers):
        cast_params.append(params[2 * i].astype(compute_dtype))
        cast_params.append(params[2 * i + 1].astype(jnp.float32))
    cast_params.append(params[-2].astype(jnp.float32))
    cast_params.append(params[-1].astype(jnp.float32))

    # --- VMEM budget -> max batch tile ----------------------------------------
    x_row_vmem = _round_up(dim, _LANE) * itemsize          # lane-padded x row in VMEM
    act_row_vmem = _round_up(n_nodes, _SUBLANE) * 4        # one (H, TB) f32 slab, per lane col
    out_row_vmem = _SUBLANE * 4                            # (1, TB) padded to 8 sublanes
    live_act_slabs = 4                                     # dot out / +bias / act / cast
    per_row = 2 * x_row_vmem + 2 * out_row_vmem + live_act_slabs * act_row_vmem
    param_vmem = sum(
        _round_up(p.shape[0], _SUBLANE) * _round_up(p.shape[1], _LANE) * p.dtype.itemsize
        for p in cast_params)
    headroom = 6 << 20                                     # compiler temporaries
    ceiling = _vmem_ceiling_bytes()
    tb_vmem_max = max(
        ((ceiling - headroom - 2 * param_vmem) // per_row) // _LANE * _LANE, _LANE)

    # --- batch tile selection ---------------------------------------------------
    # Target >= ~2 MiB of x HBM traffic per grid step (amortizes the ~0.35 us
    # per-step overhead); keep >= 2 grid steps when halving still moves >= 1 MiB
    # per step so v7x's second TensorCore gets work via the "parallel" axis.
    row_hbm = max(dim * itemsize, 1)
    if block_rows is None:
        block_rows = max((2 << 20) // row_hbm, 2048)
    tb = _round_up(min(block_rows, max(batch, 1)), _LANE)
    half = _round_up(_cdiv(batch, 2), _LANE)
    if half * row_hbm >= (1 << 20):
        tb = min(tb, half)
    tb = max(min(tb, tb_vmem_max), _LANE)
    grid_steps = _cdiv(batch, tb)
    out_cols = grid_steps * tb          # lane-dense padded output slab (4 B/row, negligible)

    # --- specs -------------------------------------------------------------------
    # x is streamed in (tb, dim) tiles; the last partial block is handled by
    # Pallas' implicit block padding (no host-side jnp.pad copy of x).  Rows are
    # independent, so garbage in padded rows only affects padded output lanes,
    # which the final [:, :batch] slice discards.
    in_specs = [pl.BlockSpec((tb, dim), lambda i: (i, 0))]        # x: streamed tiles
    for p in cast_params:                                          # params: VMEM-resident
        in_specs.append(pl.BlockSpec(p.shape, lambda i: (0, 0)))
    out_specs = pl.BlockSpec((1, tb), lambda i: (0, i))            # lane-dense unmasked stores

    # tb was chosen so that vmem_needed + headroom <= ceiling; the limit is never
    # clipped below what the kernel actually needs.
    vmem_needed = tb * per_row + 2 * param_vmem
    vmem_limit = min(max(vmem_needed + headroom, 16 << 20), ceiling)

    # --- advisory cost estimate ----------------------------------------------
    flops = 2 * batch * (dim * n_nodes
                         + (n_hidden_layers - 1) * n_nodes * n_nodes
                         + n_nodes)
    transc = 0
    if hidden_act in ("gelu", "sigmoid", "tanh", "softplus"):
        transc += batch * n_nodes * n_hidden_layers
    if output_act in ("gelu", "sigmoid", "tanh", "softplus"):
        transc += batch
    bytes_accessed = (batch * dim * itemsize + out_cols * 4
                      + sum(p.size * p.dtype.itemsize for p in cast_params))

    kernel = _make_mlp_kernel(n_hidden_layers, hidden_act, output_act, compute_dtype)

    out = pl.pallas_call(
        kernel,
        out_shape=jax.ShapeDtypeStruct((1, out_cols), jnp.float32),
        grid=(grid_steps,),
        in_specs=in_specs,
        out_specs=out_specs,
        compiler_params=pltpu.CompilerParams(
            dimension_semantics=("parallel",),
            vmem_limit_bytes=vmem_limit),
        cost_estimate=pl.CostEstimate(flops=flops,
                                      transcendentals=transc,
                                      bytes_accessed=bytes_accessed),
    )(x2d, *cast_params)

    # lane-dense (1, out_cols) slab -> (B, 1) like the PyTorch module
    return out[0, :batch].reshape(batch, 1)


def mlp_estimator_ref(x, params, *, n_hidden_layers, hidden_act, output_act):
    """Pure-JAX reference for correctness checking (f32 end to end)."""
    acts = {
        "relu": lambda h: jnp.maximum(h, 0.0),
        "gelu": jax.nn.gelu,
        "sigmoid": jax.nn.sigmoid,
        "tanh": jnp.tanh,
        "softplus": jax.nn.softplus,
        "linear": lambda h: h,
    }
    h = x.reshape(x.shape[0], -1).astype(jnp.float32)
    for i in range(n_hidden_layers):
        w = params[2 * i]          # (out, in)
        b = params[2 * i + 1]      # (out, 1)
        h = acts[hidden_act](h @ w.T + b.T)
    y = h @ params[-2] + params[-1]          # (B, H) @ (H, 1) + (1, 1)
    return acts[output_act](y)


if __name__ == "__main__":
    # args (synthetic): n_hidden_layers=2, n_hidden_nodes=32,
    #                   hidden_act='relu', output_act='sigmoid'
    N_HIDDEN_LAYERS = 2
    N_HIDDEN_NODES = 32
    HIDDEN_ACT = "relu"
    OUTPUT_ACT = "sigmoid"

    # small NCHW input, flattened dim = 4 * 4 * 2 = 32
    B, C, H, W = 8, 4, 4, 2
    DIM = C * H * W

    key = jax.random.PRNGKey(0)
    key_x, key_p, key_x2 = jax.random.split(key, 3)
    x = jax.random.normal(key_x, (B, C, H, W), jnp.float32)
    params = init_mlp_params(key_p, DIM, N_HIDDEN_NODES, N_HIDDEN_LAYERS)

    kwargs = dict(n_hidden_layers=N_HIDDEN_LAYERS, hidden_act=HIDDEN_ACT,
                  output_act=OUTPUT_ACT)

    ref = mlp_estimator_ref(x, params, **kwargs)

    # f32 path: exact-ish match against the reference.
    out = mlp_estimator_forward(x, params, **kwargs)
    out = jax.block_until_ready(out)
    assert out.shape == (B, 1), out.shape
    assert jnp.allclose(out, ref, atol=1e-5, rtol=1e-5), (out, ref)

    # bf16-input fast path (halves the dominant x HBM read; f32 accumulation kept).
    out_bf16 = mlp_estimator_forward(x.astype(jnp.bfloat16), params, **kwargs)
    out_bf16 = jax.block_until_ready(out_bf16)
    assert out_bf16.shape == (B, 1), out_bf16.shape
    assert jnp.allclose(out_bf16, ref, atol=2e-2, rtol=0), (out_bf16, ref)

    # Multi-step grid with a partial last block and no jnp.pad copy of x
    # (1000 = 3*256 + 232): exercises the masked-last-block path.
    B2 = 1000
    x2 = jax.random.normal(key_x2, (B2, C, H, W), jnp.float32)
    ref2 = mlp_estimator_ref(x2, params, **kwargs)
    out2 = mlp_estimator_forward(x2, params, block_rows=256, **kwargs)
    out2 = jax.block_until_ready(out2)
    assert out2.shape == (B2, 1), out2.shape
    assert jnp.allclose(out2, ref2, atol=1e-5, rtol=1e-5)

    print("KERNEL_OK")
</pallas_src>

<mosaic_0001>
module attributes {stable_mosaic.version = 11 : i64} {
  func.func @kernel(%arg0: i32, %arg1: memref<128x32xf32, #tpu.memory_space<vmem>>, %arg2: memref<32x32xf32, #tpu.memory_space<vmem>>, %arg3: memref<32x1xf32, #tpu.memory_space<vmem>>, %arg4: memref<32x32xf32, #tpu.memory_space<vmem>>, %arg5: memref<32x1xf32, #tpu.memory_space<vmem>>, %arg6: memref<32x1xf32, #tpu.memory_space<vmem>>, %arg7: memref<1x1xf32, #tpu.memory_space<vmem>>, %arg8: memref<1x128xf32, #tpu.memory_space<vmem>>) attributes {dimension_semantics = [#tpu.dimension_semantics<parallel>], iteration_bounds = array<i64: 1>, scalar_prefetch = 0 : i64, scratch_operands = 0 : i64, tpu.core_type = #tpu.core_type<tc>, window_params = [{transform_indices = @transform_0, window_bounds = array<i64: 128, 32>}, {pipeline_mode = #tpu.pipeline_mode<synchronous>, transform_indices = @transform_1, window_bounds = array<i64: 32, 32>}, {pipeline_mode = #tpu.pipeline_mode<synchronous>, transform_indices = @transform_2, window_bounds = array<i64: 32, 1>}, {pipeline_mode = #tpu.pipeline_mode<synchronous>, transform_indices = @transform_3, window_bounds = array<i64: 32, 32>}, {pipeline_mode = #tpu.pipeline_mode<synchronous>, transform_indices = @transform_4, window_bounds = array<i64: 32, 1>}, {pipeline_mode = #tpu.pipeline_mode<synchronous>, transform_indices = @transform_5, window_bounds = array<i64: 32, 1>}, {pipeline_mode = #tpu.pipeline_mode<synchronous>, transform_indices = @transform_6, window_bounds = array<i64: 1, 1>}, {transform_indices = @transform_7, window_bounds = array<i64: 1, 128>}]} {
    %c0 = arith.constant 0 : index
    %c0_0 = arith.constant 0 : index
    %0 = vector.load %arg1[%c0, %c0_0] : memref<128x32xf32, #tpu.memory_space<vmem>>, vector<128x32xf32>
    %c0_1 = arith.constant 0 : index
    %c0_2 = arith.constant 0 : index
    %1 = vector.load %arg2[%c0_1, %c0_2] : memref<32x32xf32, #tpu.memory_space<vmem>>, vector<32x32xf32>
    %cst = arith.constant dense<0.000000e+00> : vector<32x128xf32>
    %2 = tpu.matmul %1, %0, %cst {dimension_numbers = #tpu.dot_dimension_numbers<[1], [1], [0], [0], [0, 0, 1, 0], [], []>} : vector<32x32xf32>, vector<128x32xf32>, vector<32x128xf32> -> vector<32x128xf32>
    %c0_3 = arith.constant 0 : index
    %c0_4 = arith.constant 0 : index
    %3 = vector.load %arg3[%c0_3, %c0_4] : memref<32x1xf32, #tpu.memory_space<vmem>>, vector<32x1xf32>
    %4 = vector.broadcast %3 : vector<32x1xf32> to vector<32x128xf32>
    %5 = arith.addf %2, %4 : vector<32x128xf32>
    %cst_5 = arith.constant 0.000000e+00 : f32
    %6 = vector.broadcast %cst_5 : f32 to vector<32x128xf32>
    %7 = arith.maximumf %5, %6 : vector<32x128xf32>
    %c0_6 = arith.constant 0 : index
    %c0_7 = arith.constant 0 : index
    %8 = vector.load %arg4[%c0_6, %c0_7] : memref<32x32xf32, #tpu.memory_space<vmem>>, vector<32x32xf32>
    %c0_8 = arith.constant 0 : index
    %c0_9 = arith.constant 0 : index
    %9 = vector.load %arg5[%c0_8, %c0_9] : memref<32x1xf32, #tpu.memory_space<vmem>>, vector<32x1xf32>
    %cst_10 = arith.constant dense<0.000000e+00> : vector<32x128xf32>
    %10 = tpu.matmul %8, %7, %cst_10 {dimension_numbers = #tpu.dot_dimension_numbers<[1], [0], [0], [1], [0, 0, 1, 1], [], []>} : vector<32x32xf32>, vector<32x128xf32>, vector<32x128xf32> -> vector<32x128xf32>
    %11 = vector.broadcast %9 : vector<32x1xf32> to vector<32x128xf32>
    %12 = arith.addf %10, %11 : vector<32x128xf32>
    %cst_11 = arith.constant 0.000000e+00 : f32
    %13 = vector.broadcast %cst_11 : f32 to vector<32x128xf32>
    %14 = arith.maximumf %12, %13 : vector<32x128xf32>
    %c0_12 = arith.constant 0 : index
    %c0_13 = arith.constant 0 : index
    %15 = vector.load %arg6[%c0_12, %c0_13] : memref<32x1xf32, #tpu.memory_space<vmem>>, vector<32x1xf32>
    %c0_14 = arith.constant 0 : index
    %c0_15 = arith.constant 0 : index
    %16 = vector.load %arg7[%c0_14, %c0_15] : memref<1x1xf32, #tpu.memory_space<vmem>>, vector<1x1xf32>
    %17 = vector.broadcast %15 : vector<32x1xf32> to vector<32x128xf32>
    %18 = arith.mulf %17, %14 : vector<32x128xf32>
    %cst_16 = arith.constant dense<0.000000e+00> : vector<128xf32>
    %19 = vector.multi_reduction <add>, %18, %cst_16 [0] : vector<32x128xf32> to vector<128xf32>
    %20 = vector.shape_cast %19 : vector<128xf32> to vector<1x128xf32>
    %21 = vector.broadcast %16 : vector<1x1xf32> to vector<1x128xf32>
    %22 = arith.addf %20, %21 : vector<1x128xf32>
    %23 = arith.negf %22 : vector<1x128xf32>
    %24 = math.exp %23 : vector<1x128xf32>
    %cst_17 = arith.constant 1.000000e+00 : f32
    %25 = vector.broadcast %cst_17 : f32 to vector<1x128xf32>
    %26 = arith.addf %25, %24 : vector<1x128xf32>
    %27 = arith.divf %25, %26 : vector<1x128xf32>
    %c0_18 = arith.constant 0 : index
    %c0_19 = arith.constant 0 : index
    %28 = vector.load %arg8[%c0_18, %c0_19] : memref<1x128xf32, #tpu.memory_space<vmem>>, vector<1x128xf32>
    tpu.vector_store %arg8[%c0_18, %c0_19], %27 {strides = array<i32>} : memref<1x128xf32, #tpu.memory_space<vmem>>, vector<1x128xf32>,
    return
  }
  func.func @transform_0(%arg0: i32) -> (i32, i32) {
    %c0_i32 = arith.constant 0 : i32
    %c0_i32_0 = arith.constant 0 : i32
    return %arg0, %c0_i32 : i32, i32
  }
  func.func @transform_1(%arg0: i32) -> (i32, i32) {
    %c0_i32 = arith.constant 0 : i32
    %c0_i32_0 = arith.constant 0 : i32
    %c0_i32_1 = arith.constant 0 : i32
    return %c0_i32, %c0_i32_0 : i32, i32
  }
  func.func @transform_2(%arg0: i32) -> (i32, i32) {
    %c0_i32 = arith.constant 0 : i32
    %c0_i32_0 = arith.constant 0 : i32
    %c0_i32_1 = arith.constant 0 : i32
    return %c0_i32, %c0_i32_0 : i32, i32
  }
  func.func @transform_3(%arg0: i32) -> (i32, i32) {
    %c0_i32 = arith.constant 0 : i32
    %c0_i32_0 = arith.constant 0 : i32
    %c0_i32_1 = arith.constant 0 : i32
    return %c0_i32, %c0_i32_0 : i32, i32
  }
  func.func @transform_4(%arg0: i32) -> (i32, i32) {
    %c0_i32 = arith.constant 0 : i32
    %c0_i32_0 = arith.constant 0 : i32
    %c0_i32_1 = arith.constant 0 : i32
    return %c0_i32, %c0_i32_0 : i32, i32
  }
  func.func @transform_5(%arg0: i32) -> (i32, i32) {
    %c0_i32 = arith.constant 0 : i32
    %c0_i32_0 = arith.constant 0 : i32
    %c0_i32_1 = arith.constant 0 : i32
    return %c0_i32, %c0_i32_0 : i32, i32
  }
  func.func @transform_6(%arg0: i32) -> (i32, i32) {
    %c0_i32 = arith.constant 0 : i32
    %c0_i32_0 = arith.constant 0 : i32
    %c0_i32_1 = arith.constant 0 : i32
    return %c0_i32, %c0_i32_0 : i32, i32
  }
  func.func @transform_7(%arg0: i32) -> (i32, i32) {
    %c0_i32 = arith.constant 0 : i32
    %c0_i32_0 = arith.constant 0 : i32
    return %c0_i32, %arg0 : i32, i32
  }
}

</mosaic_0001>

<bundles_post_ra>
// kernel: mlp_estimator_forward.1
= control target key start
LH: loop header
LB: loop body
LE: loop exit
PB: predicated region body
PF: predicated region fallthrough
CT: control target
= control target key end

     0   :  { %vm72_vm0 = vcmask 261120   ;;  %v522_v2 = vmov 0   ;;  %s717_s0 = inlined_call_operand.vmem [shape: f32[8,32], index: 0, kind: input, shape index: {}]   ;;  %s718_s6 = inlined_call_operand.<no memory space> [shape: f32[1,1], index: 6, kind: input, shape index: {}]   ;;  %s719_s1 = inlined_call_operand.vmem [shape: f32[32,32], index: 1, kind: input, shape index: {}]   ;;  %s720_s2 = inlined_call_operand.vmem [shape: f32[32,1], index: 2, kind: input, shape index: {}]   ;;  %s721_s4 = inlined_call_operand.vmem [shape: f32[32,1], index: 4, kind: input, shape index: {}]   ;;  %s722_s5 = inlined_call_operand.vmem [shape: f32[32,1], index: 5, kind: input, shape index: {}]   ;;  %s723_s3 = inlined_call_operand.vmem [shape: f32[32,32], index: 3, kind: input, shape index: {}]   ;;  %s724_s7 = inlined_call_operand.vmem [shape: f32[1,128], index: 7, kind: output, shape index: {}]  }
   0x1   :  { %v43_v0 = vld [vmem:[%s717_s0 + $0x78] sm:$0xff]  ;;  %v42_v1 = vld [vmem:[%s717_s0 + $0x70] sm:$0xff]  ;;  %516 = vset.pattern.permute.xlu0 %v522_v2  ;;  %517 = vset.pattern.permute.xlu1 %v522_v2  ;;  %v12_v3 = vstv %s718_s6  ;;  %v41_v4 = vld [vmem:[%s717_s0 + $0x68] sm:$0xff] }
   0x2   :  { %463 = vmatprep.subr.msk.mxu0 %vm72_vm0, %v43_v0  ;;  %13 = vst [vmem:[#allocation2] sm:$0x1] %v12_v3  ;;  %v44_v5 = vld [vmem:[%s719_s1] sm:$0xff]  ;;  %v51_v6 = vld [vmem:[%s720_s2 + $0x18] sm:$0xff]  ;;  %v49_v7 = vld [vmem:[%s720_s2 + $0x8] sm:$0xff] }
   0x3   :  { %464 = vmatpush3.xpose.msk.msra.mxu0 %vm72_vm0, %v43_v0  ;;  %495 = vmatprep.mubr.msk.f32.mxu0 %vm72_vm0, %v44_v5  ;;  %v40_v8 = vld [vmem:[%s717_s0 + $0x60] sm:$0xff]  ;;  %v50_v9 = vld [vmem:[%s720_s2 + $0x10] sm:$0xff]  ;;  %v39_v11 = vld [vmem:[%s717_s0 + $0x58] sm:$0xff] }
   0x4   :  { %465 = vmatprep.subr.msk.mxu0 %vm72_vm0, %v42_v1  ;;  %69 = vperm.xlu0 %516, %v51_v6   ;;  %v48_v10 = vld [vmem:[%s720_s2] sm:$0xff]  ;;  %v227_v13 = vld [vmem:[%s721_s4 + $0x8] sm:$0xff]  ;;  %v38_v14 = vld [vmem:[%s717_s0 + $0x50] sm:$0xff] }
   0x5   :  { %59 = vperm.xlu1 %517, %v49_v7   ;;  %v226_v12 = vld [vmem:[%s721_s4] sm:$0xff]  ;;  %v228_v15 = vld [vmem:[%s721_s4 + $0x10] sm:$0xff]  ;;  %v229_v16 = vld [vmem:[%s721_s4 + $0x18] sm:$0xff] }
   0x6   :  { %v37_v17 = vld [vmem:[%s717_s0 + $0x48] sm:$0xff]  ;;  %v351_v18 = vld [vmem:[%s722_s5] sm:$0xff]  ;;  %v353_v21 = vld [vmem:[%s722_s5 + $0x10] sm:$0xff] }
   0x7   :  { %466 = vmatpush3.xpose.msk.msra.mxu0 %vm72_vm0, %v42_v1  ;;  %v352_v19 = vld [vmem:[%s722_s5 + $0x8] sm:$0xff]  ;;  %v36_v20 = vld [vmem:[%s717_s0 + $0x40] sm:$0xff]  ;;  %v354_v22 = vld [vmem:[%s722_s5 + $0x18] sm:$0xff] }
   0x8   :  { %467 = vmatprep.subr.msk.mxu0 %vm72_vm0, %v41_v4  ;;  %64 = vperm.xlu0 %516, %v50_v9   ;;  %v35_v23 = vld [vmem:[%s717_s0 + $0x38] sm:$0xff]  ;;  %v34_v25 = vld [vmem:[%s717_s0 + $0x30] sm:$0xff]  ;;  %v33_v26 = vld [vmem:[%s717_s0 + $0x28] sm:$0xff] }
   0x9   :  { %54 = vperm.xlu1 %517, %v48_v10   ;;  %v355_v24 = vld [vmem:[#allocation2] sm:$0x1]  ;;  %v31_v28 = vld [vmem:[%s717_s0 + $0x18] sm:$0xff]  ;;  %v30_v29 = vld [vmem:[%s717_s0 + $0x10] sm:$0xff] }
   0xa   :  { %v32_v27 = vld [vmem:[%s717_s0 + $0x20] sm:$0xff]  ;;  %v29_v30 = vld [vmem:[%s717_s0 + $0x8] sm:$0xff]  ;;  %v46_v33 = vld [vmem:[%s719_s1 + $0x10] sm:$0xff] }
   0xb   :  { %468 = vmatpush3.xpose.msk.msra.mxu0 %vm72_vm0, %v41_v4  ;;  %v28_v31 = vld [vmem:[%s717_s0] sm:$0xff]  ;;  %v45_v32 = vld [vmem:[%s719_s1 + $0x8] sm:$0xff]  ;;  %v47_v34 = vld [vmem:[%s719_s1 + $0x18] sm:$0xff] }
   0xc   :  { %469 = vmatprep.subr.msk.mxu0 %vm72_vm0, %v40_v8  ;;  %232 = vperm.xlu0 %516, %v226_v12   ;;  %v222_v35 = vld [vmem:[%s723_s3] sm:$0xff]  ;;  %v223_v52 = vld [vmem:[%s723_s3 + $0x8] sm:$0xff]  ;;  %v224_v53 = vld [vmem:[%s723_s3 + $0x10] sm:$0xff] }
   0xd   :  { %237 = vperm.xlu1 %517, %v227_v13   ;;  %509 = vmatprep.mubr.msk.f32.mxu1 %vm72_vm0, %v222_v35  ;;  %v225_v54 = vld [vmem:[%s723_s3 + $0x18] sm:$0xff] }
   0xf   :  { %470 = vmatpush3.xpose.msk.msra.mxu0 %vm72_vm0, %v40_v8 }
  0x10   :  { %471 = vmatprep.subr.msk.mxu0 %vm72_vm0, %v39_v11  ;;  %242 = vperm.xlu0 %516, %v228_v15  }
  0x11   :  { %247 = vperm.xlu1 %517, %v229_v16  }
  0x13   :  { %472 = vmatpush3.xpose.msk.msra.mxu0 %vm72_vm0, %v39_v11 }
  0x14   :  { %473 = vmatprep.subr.msk.mxu0 %vm72_vm0, %v38_v14  ;;  %358 = vperm.xlu0 %516, %v351_v18  }
  0x15   :  { %363 = vperm.xlu1 %517, %v352_v19  }
  0x17   :  { %474 = vmatpush3.xpose.msk.msra.mxu0 %vm72_vm0, %v38_v14 }
  0x18   :  { %475 = vmatprep.subr.msk.mxu0 %vm72_vm0, %v37_v17  ;;  %368 = vperm.xlu0 %516, %v353_v21  }
  0x19   :  { %373 = vperm.xlu1 %517, %v354_v22  }
  0x1b   :  { %476 = vmatpush3.xpose.msk.msra.mxu0 %vm72_vm0, %v37_v17  ;;  %v394_v17 = vlaneseq }
  0x1c   :  { %477 = vmatprep.subr.msk.mxu0 %vm72_vm0, %v36_v20  ;;  %391 = vperm.xlu0 %516, %v355_v24  }
  0x1f   :  { %478 = vmatpush3.xpose.msk.msra.mxu0 %vm72_vm0, %v36_v20  ;;  %v395_v20 = vshrl.u32 %v394_v17, 7 }
  0x20   :  { %479 = vmatprep.subr.msk.mxu0 %vm72_vm0, %v35_v23 }
  0x23   :  { %480 = vmatpush3.xpose.msk.msra.mxu0 %vm72_vm0, %v35_v23  ;;  %v396_v23 = vsub.s32 0, %v395_v20 }
  0x24   :  { %481 = vmatprep.subr.msk.mxu0 %vm72_vm0, %v34_v25 }
  0x27   :  { %482 = vmatpush3.xpose.msk.msra.mxu0 %vm72_vm0, %v34_v25 }
  0x28   :  { %483 = vmatprep.subr.msk.mxu0 %vm72_vm0, %v33_v26 }
  0x2b   :  { %484 = vmatpush3.xpose.msk.msra.mxu0 %vm72_vm0, %v33_v26 }
  0x2c   :  { %485 = vmatprep.subr.msk.mxu0 %vm72_vm0, %v32_v27 }
  0x2f   :  { %486 = vmatpush3.xpose.msk.msra.mxu0 %vm72_vm0, %v32_v27 }
  0x30   :  { %487 = vmatprep.subr.msk.mxu0 %vm72_vm0, %v31_v28 }
  0x33   :  { %488 = vmatpush3.xpose.msk.msra.mxu0 %vm72_vm0, %v31_v28 }
  0x34   :  { %489 = vmatprep.subr.msk.mxu0 %vm72_vm0, %v30_v29 }
  0x37   :  { %490 = vmatpush3.xpose.msk.msra.mxu0 %vm72_vm0, %v30_v29 }
  0x38   :  { %491 = vmatprep.subr.msk.mxu0 %vm72_vm0, %v29_v30 }
  0x3b   :  { %492 = vmatpush3.xpose.msk.msra.mxu0 %vm72_vm0, %v29_v30 }
  0x3c   :  { %493 = vmatprep.subr.msk.mxu0 %vm72_vm0, %v28_v31 }
  0x3f   :  { %494 = vmatpush3.xpose.msk.msra.mxu0 %vm72_vm0, %v28_v31 }
  0x42   :  { %496 = vmatmul.mubr.msk.f32.vlgmr.msra.gmra.mxu0 %vm72_vm0, %v45_v32 }
  0x43   :  { %498 = vmatprep.mubr.msk.f32.mxu0 %vm72_vm0, %v46_v33 }
  0x46   :  { %499 = vmatmul.mubr.msk.f32.gmra.mxu0 %vm72_vm0, %v47_v34 }
  0x7f   :  { %v70_v36 = vpop.permute.xlu0 %69 }
  0x80   :  { %v60_v38 = vpop.permute.xlu1 %59 }
  0x83   :  { %v65_v42 = vpop.permute.xlu0 %64 }
  0x84   :  { %v55_v47 = vpop.permute.xlu1 %54 }
  0x87   :  { %v233_v55 = vpop.permute.xlu0 %232 }
  0x88   :  { %v238_v56 = vpop.permute.xlu1 %237 }
  0x8b   :  { %v243_v57 = vpop.permute.xlu0 %242 }
  0x8c   :  { %v248_v58 = vpop.permute.xlu1 %247 }
  0x8f   :  { %v359_v63 = vpop.permute.xlu0 %358 }
  0x90   :  { %v364_v4 = vpop.permute.xlu1 %363 }
  0x93   :  { %v369_v11 = vpop.permute.xlu0 %368 }
  0x94   :  { %v374_v14 = vpop.permute.xlu1 %373 }
  0x97   :  { %v392_v25 = vpop.permute.xlu0 %391 }
  0x98   :  { %v397_v27 = vrot.slane %v392_v25, %v396_v23 }
 0x102   :  { %v497_v37 = vpop.f32.mrf.mxu0 }
 0x103   :  { %v205_v44 = vadd.f32 %v497_v37, %v60_v38 }
 0x104   :  { %v199_v39 = vpop.f32.mrf.mxu0 }
 0x105   :  { %v200_v48 = vadd.f32 %v199_v39, %v55_v47  ;;  %v219_v50 = vmax.f32 %v205_v44, 0.0 }
 0x106   :  { %v500_v40 = vpop.f32.mrf.mxu0 }
 0x107   :  { %v215_v41 = vadd.f32 %v500_v40, %v70_v36  ;;  %v218_v51 = vmax.f32 %v200_v48, 0.0 }
 0x108   :  { %v209_v43 = vpop.f32.mrf.mxu0 }
 0x109   :  { %v221_v45 = vmax.f32 %v215_v41, 0.0  ;;  %v210_v46 = vadd.f32 %v209_v43, %v65_v42 }
 0x10b   :  { %v220_v49 = vmax.f32 %v210_v46, 0.0  ;;  %501 = vmatprep.subr.mxu1 %v221_v45 }
 0x10c   :  { %502 = vmatpush3.msra.mxu1 %v221_v45 }
 0x10d   :  { %503 = vmatprep.subr.mxu1 %v220_v49 }
 0x10e   :  { %504 = vmatpush3.msra.mxu1 %v220_v49 }
 0x10f   :  { %505 = vmatprep.subr.mxu1 %v219_v50 }
 0x110   :  { %506 = vmatpush3.msra.mxu1 %v219_v50 }
 0x111   :  { %507 = vmatprep.subr.mxu1 %v218_v51 }
 0x112   :  { %508 = vmatpush3.msra.mxu1 %v218_v51 }
 0x113   :  { %510 = vmatmul.mubr.msk.f32.vlgmr.msra.gmra.mxu1 %vm72_vm0, %v223_v52 }
 0x114   :  { %512 = vmatprep.mubr.msk.f32.mxu1 %vm72_vm0, %v224_v53 }
 0x117   :  { %513 = vmatmul.mubr.msk.f32.gmra.mxu1 %vm72_vm0, %v225_v54 }
 0x1d3   :  { %v511_v59 = vpop.f32.mrf.mxu1 }
 0x1d4   :  { %v334_v60 = vadd.f32 %v511_v59, %v238_v56 }
 0x1d5   :  { %v328_v61 = vpop.f32.mrf.mxu1 }
 0x1d6   :  { %v329_v62 = vadd.f32 %v328_v61, %v233_v55  ;;  %v348_v1 = vmax.f32 %v334_v60, 0.0 }
 0x1d7   :  { %v514_v0 = vpop.f32.mrf.mxu1 }
 0x1d8   :  { %v347_v2 = vmax.f32 %v329_v62, 0.0  ;;  %v344_v3 = vadd.f32 %v514_v0, %v248_v58  ;;  %v377_v8 = vmul.f32 %v364_v4, %v348_v1 }
 0x1d9   :  { %v338_v5 = vpop.f32.mrf.mxu1 }
 0x1da   :  { %v376_v6 = vmul.f32 %v359_v63, %v347_v2  ;;  %v339_v7 = vadd.f32 %v338_v5, %v243_v57  ;;  %v350_v9 = vmax.f32 %v344_v3, 0.0 }
 0x1dc   :  { %v349_v10 = vmax.f32 %v339_v7, 0.0  ;;  %v380_v12 = vadd.f32 %v377_v8, %v376_v6  ;;  %v379_v15 = vmul.f32 %v374_v14, %v350_v9 }
 0x1de   :  { %v378_v13 = vmul.f32 %v369_v11, %v349_v10 }
 0x1e0   :  { %v381_v16 = vadd.f32 %v380_v12, %v378_v13 }
 0x1e2   :  { %v382_v18 = vadd.f32 %v381_v16, %v379_v15 }
 0x1e4   :  { %v383_v19 = vrot.slane %v382_v18, 4 }
 0x1e6   :  { %v384_v21 = vadd.f32 %v383_v19, %v382_v18 }
 0x1e8   :  { %v385_v22 = vrot.slane %v384_v21, 2 }
 0x1ea   :  { %v386_v24 = vadd.f32 %v385_v22, %v384_v21 }
 0x1ec   :  { %v387_v26 = vrot.slane %v386_v24, 1 }
 0x1ee   :  { %v388_v28 = vadd.f32 %v387_v26, %v386_v24 }
 0x1f0   :  { %v398_v29 = vadd.f32 %v397_v27, %v388_v28 }
 0x1f2   :  { %v434_v30 = vmul.f32 -1.442695, %v398_v29 }
 0x1f4   :  { %518 = vpow2.f32 %v434_v30 }
 0x201   :  { %v519_v31 = vpop.eup %518 }
 0x202   :  { %v402_v32 = vadd.f32 1.0, %v519_v31 }
 0x204   :  { %520 = vrcp.f32 %v402_v32 }
 0x211   :  { %v521_v33 = vpop.eup %520 }
 0x212   :  { %405 = vst [vmem:[%s724_s7] sm:$0x1] %v521_v33 }

</bundles_post_ra>
